<compile_context>
chip_gen: v5e
topology: v5e:2x2
jax: 0.10.0
libtpu: 0.0.40
codegen_flags: <defaults>
</compile_context>

<pallas_src>
import math

import jax
import jax.numpy as jnp
from jax.experimental import pallas as pl
from jax.experimental.pallas import tpu as pltpu


# ----------------------------------------------------------------------------
# PE buffer (same values as the PyTorch module's registered buffer).
# ----------------------------------------------------------------------------
def build_pe(d_model: int, max_len: int = 5000, dtype=jnp.float32) -> jnp.ndarray:
    """Sinusoidal positional encoding, shape (max_len, 1, d_model)."""
    position = jnp.arange(max_len, dtype=jnp.float32)[:, None]            # (max_len, 1)
    div_term = jnp.exp(
        jnp.arange(0, d_model, 2, dtype=jnp.float32) * (-math.log(10000.0) / d_model)
    )                                                                      # (ceil(d/2),)
    angles = position * div_term                                           # (max_len, ceil(d/2))
    pe = jnp.zeros((max_len, d_model), dtype=jnp.float32)
    pe = pe.at[:, 0::2].set(jnp.sin(angles))
    pe = pe.at[:, 1::2].set(jnp.cos(angles[:, : d_model // 2]))
    return pe[:, None, :].astype(dtype)                                    # (max_len, 1, d_model)


# ----------------------------------------------------------------------------
# Kernel body: broadcast-add one (tile_seq, tile_batch, d_model) block.
# ----------------------------------------------------------------------------
def _pe_add_kernel(x_ref, pe_ref, o_ref):
    # x_ref : (tile_seq, tile_batch, d_model)
    # pe_ref: (tile_seq, 1,          d_model)  -> broadcast over batch in VMEM
    # Accumulate in f32 (matches PyTorch promotion for bf16 x + f32 pe); cast
    # only on store.  VPU cost is hidden under the HBM DMAs.
    x = x_ref[...].astype(jnp.float32)
    p = pe_ref[...].astype(jnp.float32)
    o_ref[...] = (x + p).astype(o_ref.dtype)


# ----------------------------------------------------------------------------
# Tile selection: padded-VMEM-aware, generation-safe.
# ----------------------------------------------------------------------------
_SUBLANE_PACK = {4: 8, 2: 16, 1: 32}   # sublane packing by itemsize


def _round_up(x: int, m: int) -> int:
    return ((x + m - 1) // m) * m


def _cdiv(a: int, b: int) -> int:
    return -(-a // b)


def _x_block_bytes(ts: int, tb: int, d_model: int, itemsize: int) -> int:
    """Padded VMEM bytes of one (ts, tb, d_model) activation block."""
    pack = _SUBLANE_PACK.get(itemsize, 8)
    return ts * _round_up(tb, pack) * _round_up(d_model, 128) * itemsize


def _pe_block_bytes(ts: int, d_model: int) -> int:
    """Padded VMEM bytes of one (ts, 1, d_model) f32 pe block (dim 1 pads to 8)."""
    return ts * 8 * _round_up(d_model, 128) * 4


def _choose_tiles(seq: int, batch: int, d_model: int, itemsize: int,
                  x_block_target: int = 4 * 1024 * 1024,
                  total_budget: int = 24 * 1024 * 1024) -> tuple[int, int]:
    """Pick (tile_seq, tile_batch) with padded footprints in mind.

    Budget = 2 x-block buffers + 2 out-block buffers + 2 pe-block buffers,
    kept under `total_budget` (safe for v5e 16 MiB scoped default once we raise
    vmem_limit_bytes, v6e 32 MiB scoped, v7x 32 MiB scoped / 64 MiB physical).
    """
    pack = _SUBLANE_PACK.get(itemsize, 8)

    # Batch tiling only if a single padded seq row already exceeds the target.
    tile_batch = batch
    if _x_block_bytes(1, batch, d_model, itemsize) > x_block_target:
        rows = max(1, x_block_target // (_round_up(d_model, 128) * itemsize))
        tile_batch = max(pack, (rows // pack) * pack)     # multiple of sublane pack
        tile_batch = min(tile_batch, batch)

    # Seq tiling toward the per-block target.
    row_bytes = _x_block_bytes(1, tile_batch, d_model, itemsize)
    tile_seq = max(1, min(seq, x_block_target // max(row_bytes, 1)))
    if tile_seq >= 8:
        tile_seq -= tile_seq % 8                          # DMA-friendly alignment

    def total(ts: int, tb: int) -> int:
        return 4 * _x_block_bytes(ts, tb, d_model, itemsize) + 2 * _pe_block_bytes(ts, d_model)

    # Shrink until the double-buffered footprint fits the budget.
    while tile_seq > 1 and total(tile_seq, tile_batch) > total_budget:
        tile_seq = max(1, tile_seq // 2)
    while tile_batch > pack and total(tile_seq, tile_batch) > total_budget:
        tile_batch = max(pack, ((tile_batch // 2) // pack) * pack or pack)

    # v7x: make sure both TensorCores get work (>= 2 grid blocks when possible).
    if _cdiv(seq, tile_seq) * _cdiv(batch, tile_batch) < 2 and seq >= 2:
        tile_seq = _cdiv(seq, 2)

    return int(tile_seq), int(tile_batch)


# ----------------------------------------------------------------------------
# Wrapper.
# ----------------------------------------------------------------------------
def positional_encoding_forward(x: jnp.ndarray, pe: jnp.ndarray, *,
                                tile_seq: int | None = None,
                                tile_batch: int | None = None,
                                donate_x: bool = False) -> jnp.ndarray:
    """x: (seq, batch, d_model); pe: (max_len, 1, d_model). Returns x + pe[:seq]."""
    seq, batch, d_model = x.shape
    max_len = pe.shape[0]
    assert seq <= max_len, f"seq ({seq}) exceeds pe max_len ({max_len})"
    assert pe.shape == (max_len, 1, d_model), "pe must be (max_len, 1, d_model)"

    itemsize = jnp.dtype(x.dtype).itemsize
    auto_ts, auto_tb = _choose_tiles(seq, batch, d_model, itemsize)
    ts = int(min(max(tile_seq if tile_seq is not None else auto_ts, 1), seq))
    tb = int(min(max(tile_batch if tile_batch is not None else auto_tb, 1), batch))

    grid = (pl.cdiv(seq, ts), pl.cdiv(batch, tb))   # batch innermost -> pe block reused

    # Advisory cost: pure HBM-bound broadcast-add.
    pe_itemsize = jnp.dtype(pe.dtype).itemsize
    cost = pl.CostEstimate(
        flops=seq * batch * d_model,
        transcendentals=0,
        bytes_accessed=2 * seq * batch * d_model * itemsize + seq * d_model * pe_itemsize,
    )

    extra_kwargs = {}
    if donate_x:
        # Reuses x's HBM buffer for the output (caller must donate x). Note this
        # saves the output allocation, not bandwidth.
        extra_kwargs["input_output_aliases"] = {0: 0}

    return pl.pallas_call(
        _pe_add_kernel,
        out_shape=jax.ShapeDtypeStruct((seq, batch, d_model), x.dtype),
        grid_spec=pltpu.PrefetchScalarGridSpec(
            num_scalar_prefetch=0,
            grid=grid,
            in_specs=[
                # Last dim is full-extent (lane-dense whenever d_model % 128 == 0);
                # tile_batch is either == batch or a multiple of the sublane pack,
                # so the (8,128) BlockSpec rule is satisfied for any shape.
                pl.BlockSpec((ts, tb, d_model), lambda i, j: (i, j, 0)),
                # pe is passed whole; only the first ceil(seq/ts) seq-blocks are
                # ever indexed, so no host-side slice/cast is needed.
                pl.BlockSpec((ts, 1, d_model), lambda i, j: (i, 0, 0)),
            ],
            out_specs=pl.BlockSpec((ts, tb, d_model), lambda i, j: (i, j, 0)),
        ),
        compiler_params=pltpu.CompilerParams(
            # Independent tiles on both axes -> v7x shards across its 2 TCs.
            dimension_semantics=("parallel", "parallel"),
            # Covers the <=24 MiB double-buffered budget on every generation
            # (>= v5e's 16 MiB scoped default, == v6e/v7x scoped default,
            #  well under v7x's 64 MiB physical VMEM).
            vmem_limit_bytes=32 * 1024 * 1024,
        ),
        cost_estimate=cost,
        **extra_kwargs,
    )(x, pe)


# ----------------------------------------------------------------------------
# Self-test.
# ----------------------------------------------------------------------------
if __name__ == "__main__":
    key = jax.random.PRNGKey(0)
    k1, k2, k3 = jax.random.split(key, 3)
    max_len = 64

    # Primary: lane-dense d_model, auto tiling (>= 2 seq blocks -> grid (2, 1)).
    seq, batch, d_model = 16, 8, 128
    x = jax.random.normal(k1, (seq, batch, d_model), dtype=jnp.float32)
    pe = build_pe(d_model, max_len)
    out = jax.block_until_ready(positional_encoding_forward(x, pe))
    ref = x + pe[:seq]
    assert out.shape == (seq, batch, d_model)
    assert jnp.allclose(out, ref, atol=1e-6), "f32 mismatch vs reference"

    # 2-D grid path: explicit batch tiling (grid (2, 2)).
    seq4, batch4 = 8, 16
    x4 = jax.random.normal(k2, (seq4, batch4, d_model), dtype=jnp.float32)
    out4 = jax.block_until_ready(
        positional_encoding_forward(x4, pe, tile_seq=4, tile_batch=8))
    assert jnp.allclose(out4, x4 + pe[:seq4], atol=1e-6), "batch-tiled mismatch vs reference"

    # Small / non-multiple-of-128 d_model (full-extent last dims keep BlockSpec legal).
    seq2, batch2, d2 = 8, 2, 32
    x2 = jax.random.normal(k3, (seq2, batch2, d2), dtype=jnp.float32)
    pe2 = build_pe(d2, max_len)
    out2 = jax.block_until_ready(positional_encoding_forward(x2, pe2))
    assert jnp.allclose(out2, x2 + pe2[:seq2], atol=1e-6), "toy-shape mismatch vs reference"

    # bf16 x: kernel adds in f32 (PyTorch-style promotion) and stores bf16.
    x3 = x.astype(jnp.bfloat16)
    out3 = jax.block_until_ready(positional_encoding_forward(x3, pe))
    ref3 = (x3.astype(jnp.float32) + pe[:seq]).astype(jnp.bfloat16)
    assert jnp.allclose(out3.astype(jnp.float32), ref3.astype(jnp.float32), atol=1e-2), \
        "bf16 mismatch vs reference"

    print("KERNEL_OK")
</pallas_src>

<mosaic_0001>
module attributes {stable_mosaic.version = 11 : i64} {
  func.func @_pe_add_kernel(%arg0: i32, %arg1: i32, %arg2: memref<8x8x128xf32, #tpu.memory_space<vmem>>, %arg3: memref<8x1x128xf32, #tpu.memory_space<vmem>>, %arg4: memref<8x8x128xf32, #tpu.memory_space<vmem>>) attributes {dimension_semantics = [#tpu.dimension_semantics<parallel>, #tpu.dimension_semantics<parallel>], iteration_bounds = array<i64: 2, 1>, scalar_prefetch = 0 : i64, scratch_operands = 0 : i64, tpu.core_type = #tpu.core_type<tc>, window_params = [{transform_indices = @transform_0, window_bounds = array<i64: 8, 8, 128>}, {transform_indices = @transform_1, window_bounds = array<i64: 8, 1, 128>}, {transform_indices = @transform_2, window_bounds = array<i64: 8, 8, 128>}]} {
    %c0 = arith.constant 0 : index
    %c0_0 = arith.constant 0 : index
    %c0_1 = arith.constant 0 : index
    %0 = vector.load %arg2[%c0, %c0_0, %c0_1] : memref<8x8x128xf32, #tpu.memory_space<vmem>>, vector<8x8x128xf32>
    %c0_2 = arith.constant 0 : index
    %c0_3 = arith.constant 0 : index
    %c0_4 = arith.constant 0 : index
    %1 = vector.load %arg3[%c0_2, %c0_3, %c0_4] : memref<8x1x128xf32, #tpu.memory_space<vmem>>, vector<8x1x128xf32>
    %2 = vector.broadcast %1 : vector<8x1x128xf32> to vector<8x8x128xf32>
    %3 = arith.addf %0, %2 : vector<8x8x128xf32>
    %c0_5 = arith.constant 0 : index
    %c0_6 = arith.constant 0 : index
    %c0_7 = arith.constant 0 : index
    %4 = vector.load %arg4[%c0_5, %c0_6, %c0_7] : memref<8x8x128xf32, #tpu.memory_space<vmem>>, vector<8x8x128xf32>
    tpu.vector_store %arg4[%c0_5, %c0_6, %c0_7], %3 {strides = array<i32>} : memref<8x8x128xf32, #tpu.memory_space<vmem>>, vector<8x8x128xf32>,
    return
  }
  func.func @transform_0(%arg0: i32, %arg1: i32) -> (i32, i32, i32) {
    %c0_i32 = arith.constant 0 : i32
    %c0_i32_0 = arith.constant 0 : i32
    return %arg0, %arg1, %c0_i32 : i32, i32, i32
  }
  func.func @transform_1(%arg0: i32, %arg1: i32) -> (i32, i32, i32) {
    %c0_i32 = arith.constant 0 : i32
    %c0_i32_0 = arith.constant 0 : i32
    %c0_i32_1 = arith.constant 0 : i32
    return %arg0, %c0_i32, %c0_i32_0 : i32, i32, i32
  }
  func.func @transform_2(%arg0: i32, %arg1: i32) -> (i32, i32, i32) {
    %c0_i32 = arith.constant 0 : i32
    %c0_i32_0 = arith.constant 0 : i32
    return %arg0, %arg1, %c0_i32 : i32, i32, i32
  }
}

</mosaic_0001>

<bundles_post_ra>
// kernel: tpu_custom_call.1
= control target key start
LH: loop header
LB: loop body
LE: loop exit
PB: predicated region body
PF: predicated region fallthrough
CT: control target
= control target key end

     0   :  { %s843_s0 = inlined_call_operand.hbm [shape: f32[16,8,128], index: 0, kind: input, shape index: {}]   ;;  %s844_s1 = inlined_call_operand.hbm [shape: f32[64,1,128], index: 1, kind: input, shape index: {}]   ;;  %s845_s2 = inlined_call_operand.hbm [shape: f32[16,8,128], index: 2, kind: output, shape index: {}]  }
   0x1   :  { %846 = sst [smem:[#allocation11_spill]] %s843_s0 }
   0x2   :  { %7 = vsyncpa [#allocation3], 0 }
   0x3   :  { %9 = vsyncpa [#allocation3 + $0x1], 0 }
   0x4   :  { %10 = vsyncpa [#allocation6], 0 }
   0x5   :  { %12 = vsyncpa [#allocation6 + $0x1], 0 }
   0x6   :  { %13 = vsyncpa [#allocation4], 0 }
   0x7   :  { %15 = vsyncpa [#allocation4 + $0x1], 0  ;;  %s676_s9 = smov 0   ;;  %s678_s10 = smov 0  }
   0x8   :  { %s680_s11 = smov 0   ;;  %s682_s12 = smov 0  }
   0x9   :  { %s684_s13 = smov 0   ;;  %s686_s14 = smov 0  }
   0xa LB: > { %s406_s15 = sadd.s32 4294967295, %s653_s14   ;;  %s407_s16 = sadd.s32 4294967294, %s653_s14   ;;  %s653_s14 = sphi %s686_s14, %s21_s14   ;;  %s649_s13 = sphi %s684_s13, %s857_s13   ;;  %s645_s12 = sphi %s682_s12, %s856_s12   ;;  %s641_s11 = sphi %s680_s11, %s855_s11   ;;  %s637_s10 = sphi %s678_s10, %s854_s10   ;;  %s633_s9 = sphi %s676_s9, %s853_s9  }
   0xb   : > { %s33_s17 = sadd.s32 1, %s649_s13  ;;  %s42_s18 = sadd.s32 1, %s641_s11 }
   0xc   : > { %p35_p0 = scmp.ge.s32.totalorder %s33_s17, 2  ;;  %p49_p1 = scmp.ne.s32.totalorder %s641_s11, %s637_s10 }
   0xd   : > { %p50_p2 = scmp.eq.s32.totalorder %s653_s14, 0  ;;  %p55_p3 = scmp.ne.s32.totalorder %s637_s10, %s633_s9 }
   0xe   : > { %s859_s17 = smov (%p35_p0, %s33_s17), 0  ;;  %p56_p5 = scmp.eq.s32.totalorder %s406_s15, 0 }
   0xf   : > { %p717_p4 = por %p50_p2, %p49_p1  ;;  %s37_s20 = ssub.s32 %s649_s13, %s859_s17 }
  0x10   : > { %p107_p6 = scmp.eq.s32.totalorder %s406_s15, 1  ;;  %p40_p7 = scmp.eq.s32.totalorder %s37_s20, 0 }
  0x11   : > { %p723_p8 = por %p56_p5, %p55_p3  ;;  %p113_p10 = scmp.eq.s32.totalorder %s407_s16, 1 }
  0x12   : > { %p727_p9 = por %p107_p6, %p49_p1  ;;  %p409_p12 = scmp.ge.s32.totalorder %s653_s14, 2 }
  0x13   : > { %s732_s23 = scalar_select %p40_p7, %s641_s11, %s42_s18  }
  0x14   : > { %p734_p11 = por %p113_p10, %p55_p3  ;;  %p443_p13 = scmp.lt.s32.totalorder %s653_s14, 2 }
  0x15   : > { %s741_s25 = sand.u32 1, %s641_s11   ;;  %s424_s27 = sshll.u32 %s649_s13, 6 }
  0x16   : > { %s410_s26 = sshll.u32 %s741_s25, 6  ;;  %s851_s0 = sld [smem:[#allocation11_spill]] }
  0x17   : > { %s137_s3 = scalar_lea.vmem [#allocation2], %s410_s26  ;;  %p750_p0 = pnand %p443_p13, %p717_p4 }
  0x18   : > { %s146_s4 = sshll.u32 %s137_s3, 4  ;;  %p415_p1 = scmp.ge.s32.totalorder %s653_s14, 1  ;;  %s147_s4 = int_to_ptr.vmem [resolvable:$true] %s146_s4 }
  0x19   : > { %s134_s7 = scalar_lea.sflag [#allocation3], %s741_s25  ;;  %s655_s8 = smov 128  }
  0x1a   : > { %s656_s15 = smov 8   ;;  %p175_p2 = scmp.lt.s32.totalorder %s653_s14, 3 }
  0x1b   : > { %s413_s16 = sshll.u32 %s741_s25, 3  ;;  %s414_s18 = sshll.u32 %s649_s13, 3 }
  0x1c   : > { %s143_s30 = scalar_lea.hbm %s851_s0, %s424_s27  ;;  %p176_p3 = pnand %p415_p1, %p175_p2 }
  0x1d   : > { %s144_s5 = sshll.u32 %s143_s30, 4  ;;  %s164_s19 = scalar_lea.hbm %s844_s1, %s414_s18  ;;  %s145_s5 = int_to_ptr.hbm [resolvable:$true] %s144_s5 }
  0x1e   : > { %435 = dma.hbm_to_vmem [thread:$0]  (!%p750_p0), %s145_s5, 1024, %s147_s4, %s134_s7, %s655_s8, %s655_s8, %s656_s15  }
  0x1f   : > { %s160_s27 = scalar_lea.vmem [#allocation5], %s413_s16  ;;  %s165_s29 = sshll.u32 %s164_s19, 4  ;;  %s166_s29 = int_to_ptr.hbm [resolvable:$true] %s165_s29 }
  0x20   : > { %s167_s28 = sshll.u32 %s160_s27, 4  ;;  %s157_s30 = scalar_lea.sflag [#allocation6], %s741_s25  ;;  %s168_s28 = int_to_ptr.vmem [resolvable:$true] %s167_s28 }
  0x21   : > { %s657_s3 = smov 16   ;;  %s658_s0 = smov 1  }
  0x22   : > { %438 = dma.hbm_to_vmem [thread:$0]  (!%p750_p0), %s166_s29, 128, %s168_s28, %s157_s30, %s657_s3, %s657_s3, %s658_s0  }
  0x23   : > { %179 = sbr.rel (%p176_p3) target bundleno = 61 (0x3d), region = 28  ;;  %s768_s4 = sand.u32 (!%p176_p3), 1, %s637_s10  }
  0x24   : > { %s416_s5 = sshll.u32 (!%p176_p3), %s768_s4, 6  ;;  %s182_s7 = scalar_lea.sflag (!%p176_p3), [#allocation3], %s768_s4 }
  0x25   : > { %s772_s8 = scalar_lea.vmem (!%p176_p3), [#allocation2], %s416_s5 }
  0x28   : > { %620 = dma.done.wait (%p723_p8), %s182_s7, 1024  }
  0x29   : > { %622 = vsyncadd (%p723_p8), %s182_s7, 4294966272  ;;  %s417_s0 = sshll.u32 %s768_s4, 3  ;;  %s192_s25 = scalar_lea.sflag [#allocation6], %s768_s4 }
  0x2a   : > { %s780_s6 = scalar_lea.vmem [#allocation5], %s417_s0 }
  0x2b   : > { %624 = dma.done.wait (%p723_p8), %s192_s25, 128  }
  0x2c   : > { %626 = vsyncadd (%p723_p8), %s192_s25, 4294967168  ;;  %s425_s15 = sshll.u32 %s645_s12, 6  ;;  %v225_v0 = vld [vmem:[%s772_s8] sm:$0xff]  ;;  %v226_v2 = vld [vmem:[%s772_s8 + $0x8] sm:$0xff]  ;;  %s221_s20 = scalar_lea.vmem [#allocation7], %s416_s5 }
  0x2d   : > { %v499_v1 = vld [vmem:[%s780_s6] ss:$0 sm:$0xff]  ;;  %v500_v3 = vld [vmem:[%s780_s6 + $0x1] ss:$0 sm:$0xff]  ;;  %s794_s21 = scalar_lea.hbm %s845_s2, %s425_s15  ;;  %v227_v5 = vld [vmem:[%s772_s8 + $0x10] sm:$0xff]  ;;  %s295_s12 = sshll.u32 %s221_s20, 4  ;;  %s296_s12 = int_to_ptr.vmem [resolvable:$true] %s295_s12 }
  0x2e   : > { %v265_v4 = vadd.f32 %v499_v1, %v225_v0  ;;  %v501_v6 = vld [vmem:[%s780_s6 + $0x2] ss:$0 sm:$0xff]  ;;  %v266_v7 = vadd.f32 %v500_v3, %v226_v2  ;;  %v228_v8 = vld [vmem:[%s772_s8 + $0x18] sm:$0xff]  ;;  %v502_v9 = vld [vmem:[%s780_s6 + $0x3] ss:$0 sm:$0xff]  ;;  %s297_s26 = sshll.u32 %s794_s21, 4  ;;  %s298_s26 = int_to_ptr.hbm [resolvable:$true] %s297_s26 }
  0x2f   : > { %v267_v10 = vadd.f32 %v501_v6, %v227_v5  ;;  %v229_v11 = vld [vmem:[%s772_s8 + $0x20] sm:$0xff]  ;;  %v268_v13 = vadd.f32 %v502_v9, %v228_v8  ;;  %v230_v14 = vld [vmem:[%s772_s8 + $0x28] sm:$0xff]  ;;  %v231_v17 = vld [vmem:[%s772_s8 + $0x30] sm:$0xff]  ;;  %s282_s19 = scalar_lea.sflag [#allocation4], %s768_s4  ;;  %s581_s27 = sshra.s32 %s298_s26, 4  ;;  %s582_s27 = int_to_ptr.hbm [resolvable:$true] %s581_s27 }
  0x30   : > { %273 = vst [vmem:[%s221_s20] sm:$0xff] %v265_v4  ;;  %v503_v12 = vld [vmem:[%s780_s6 + $0x4] ss:$0 sm:$0xff]  ;;  %v504_v15 = vld [vmem:[%s780_s6 + $0x5] ss:$0 sm:$0xff]  ;;  %v505_v18 = vld [vmem:[%s780_s6 + $0x6] ss:$0 sm:$0xff]  ;;  %p588_p7 = scmp.lt.s32.totalorder %s582_s27, %s845_s2 }
  0x31   : > { %274 = vst [vmem:[%s221_s20 + $0x8] sm:$0xff] %v266_v7  ;;  %v269_v16 = vadd.f32 %v503_v12, %v229_v11  ;;  %v270_v19 = vadd.f32 %v504_v15, %v230_v14  ;;  %v232_v20 = vld [vmem:[%s772_s8 + $0x38] sm:$0xff]  ;;  %v506_v21 = vld [vmem:[%s780_s6 + $0x7] ss:$0 sm:$0xff]  ;;  %v271_v22 = vadd.f32 %v505_v18, %v231_v17  ;;  %s583_s28 = scalar_lea.hbm %s582_s27, 64  ;;  %s587_s3 = scalar_lea.hbm %s845_s2, 128 }
  0x32   : > { %275 = vst [vmem:[%s221_s20 + $0x10] sm:$0xff] %v267_v10  ;;  %v272_v23 = vadd.f32 %v506_v21, %v232_v20  ;;  %p584_p4 = scmp.ne.s32.totalorder %s582_s27, %s583_s28  ;;  %p589_p8 = scmp.lt.s32.totalorder %s587_s3, %s583_s28 }
  0x33   : > { %276 = vst [vmem:[%s221_s20 + $0x18] sm:$0xff] %v268_v13 }
  0x34   : > { %277 = vst [vmem:[%s221_s20 + $0x20] sm:$0xff] %v269_v16  ;;  %p585_p5 = pnand %p584_p4, %p727_p9  ;;  %p590_p10 = por %p589_p8, %p588_p7 }
  0x35   : > { %278 = vst [vmem:[%s221_s20 + $0x28] sm:$0xff] %v270_v19 }
  0x36   : > { %279 = vst [vmem:[%s221_s20 + $0x30] sm:$0xff] %v271_v22  ;;  %p586_p6 = pneg %p585_p5 }
  0x37   : > { %280 = vst [vmem:[%s221_s20 + $0x38] sm:$0xff] %v272_v23 }
  0x38   : > { %p591_p13 = pnand %p590_p10, %p586_p6 }
  0x3a   : > { %594 = shalt.err (!%p591_p13)
}
  0x3b   : > { %s659_s4 = smov 128   ;;  %s660_s8 = smov 8  }
  0x3c   : > { %430 = dma.vmem_to_hbm [thread:$0]  (%p727_p9), %s296_s12, 1024, %s298_s26, %s282_s19, %s659_s4, %s659_s4, %s660_s8  }
  0x3d PF: > { %s312_s0 = sand.u32 1, %s633_s9   ;;  %p440_p0 = pnand %p409_p12, %p734_p11 }
  0x3e   : > { %s313_s25 = scalar_lea.sflag [#allocation4], %s312_s0 }
  0x3f   : > { %p441_p1 = pneg %p440_p0 }
  0x41   : > { %628 = dma.done.wait (%p441_p1), %s313_s25, 1024  }
  0x42   : > { %630 = vsyncadd (%p441_p1), %s313_s25, 4294966272  ;;  %s21_s14 = sadd.s32 1, %s653_s14   ;;  %s853_s9 = smov %s637_s10 }
  0x43   : > { %p18_p2 = scmp.ge.s32.totalorder %s21_s14, 4   ;;  %s854_s10 = smov %s641_s11 }
  0x44   : > { %s855_s11 = smov %s732_s23  ;;  %s856_s12 = smov %s649_s13 }
  0x45   : > { %s857_s13 = smov %s859_s17  ;;  %20 = sbr.rel (!%p18_p2) target bundleno = 10 (0xa), region = 86 }
  0x4a   :  { %319 = vsyncpa [#allocation3], 1 }
  0x4b   :  { %321 = vsyncpa [#allocation3 + $0x1], 1 }
  0x4c   :  { %322 = vsyncpa [#allocation6], 1 }
  0x4d   :  { %324 = vsyncpa [#allocation6 + $0x1], 1 }
  0x4e   :  { %325 = vsyncpa [#allocation4], 1 }
  0x4f   :  { %327 = vsyncpa [#allocation4 + $0x1], 1 }

</bundles_post_ra>
